<compile_context>
chip_gen: v6e
topology: v6e:2x2x1
jax: 0.10.0
libtpu: 0.0.40
codegen_flags: <defaults>
</compile_context>

<pallas_src>
import math

import jax
import jax.numpy as jnp
import numpy as np
from jax.experimental import pallas as pl
from jax.experimental.pallas import tpu as pltpu


def _round_up(x, m):
    return ((x + m - 1) // m) * m


def _vmem_capacity_bytes():
    """Per-core VMEM capacity; conservative 64 MiB fallback (v7x) if unknown."""
    try:
        info = pltpu.get_tpu_info()
        cap = getattr(info, "vmem_capacity_bytes", None)
        if cap:
            return int(cap)
    except Exception:
        pass
    return 64 * 1024 * 1024


def _pick_tile_n(n128):
    """Pick (tn, n_pad) for a 128-rounded output width.  Prefers big,
    lane-dense tiles; only pads beyond 128-alignment when needed for tn=512."""
    if n128 <= 512:
        return n128, n128                      # single lane-dense tile
    for t in (512, 384, 256):
        if n128 % t == 0:
            return t, n128
    return 512, _round_up(n128, 512)


# ----------------------------------------------------------------------------
# Kernels
# ----------------------------------------------------------------------------
def _be_fc_kernel_resident_k(lhs_ref, w_ref, g_ref, b_ref, o_ref):
    """Whole reduction resident: one MXU pass + f32 epilogue per output tile."""
    acc = jnp.dot(lhs_ref[...], w_ref[...], preferred_element_type=jnp.float32)
    o_ref[...] = (acc * g_ref[...] + b_ref[...]).astype(o_ref.dtype)


def _be_fc_kernel_tiled_k(lhs_ref, w_ref, g_ref, b_ref, o_ref, acc_ref):
    """K-tiled fallback for very large IN: f32 accumulator across the K axis."""
    k = pl.program_id(2)

    @pl.when(k == 0)
    def _():
        acc_ref[...] = jnp.zeros_like(acc_ref)

    acc_ref[...] += jnp.dot(lhs_ref[...], w_ref[...],
                            preferred_element_type=jnp.float32)

    @pl.when(k == pl.num_programs(2) - 1)
    def _():
        o_ref[...] = (acc_ref[...] * g_ref[...] + b_ref[...]).astype(o_ref.dtype)


# ----------------------------------------------------------------------------
# Weight preparation (call once per parameter update, reuse across forwards)
# ----------------------------------------------------------------------------
def prepare_weight(w, *, use_bf16_matmul=False):
    """w: (IN, OUT) == torch Linear.weight.T.  Pads to the kernel's tile grid
    and optionally casts to bf16 so the forward never re-pads/re-casts W."""
    in_features, out_features = w.shape
    k_pad = _round_up(in_features, 128)
    _, n_pad = _pick_tile_n(_round_up(out_features, 128))
    wp = jnp.pad(w, ((0, k_pad - in_features), (0, n_pad - out_features)))
    if use_bf16_matmul:
        wp = wp.astype(jnp.bfloat16)
    return wp


# ----------------------------------------------------------------------------
# Forward
# ----------------------------------------------------------------------------
def batch_ensemble_fc(x, w, alpha, gamma, bias, *,
                      out_features=None, use_bf16_matmul=False):
    """x:(B,IN) f32, w: prepared weight from prepare_weight() (or raw (IN,OUT)),
    alpha:(B,IN), gamma:(B,OUT), bias:(B,OUT)  ->  (B,OUT)."""
    B, IN = x.shape
    if out_features is None:
        out_features = w.shape[1]          # raw, unprepared weight
    out_dtype = x.dtype

    # ---- Tile plan (N/K padding depends only on IN/OUT, matching prepare_weight)
    k_pad = _round_up(IN, 128)
    tn, n_pad = _pick_tile_n(_round_up(out_features, 128))

    lhs_dtype = jnp.bfloat16 if use_bf16_matmul else jnp.float32
    w_dtype = jnp.bfloat16 if use_bf16_matmul else out_dtype
    lhs_bytes = jnp.dtype(lhs_dtype).itemsize
    w_bytes = jnp.dtype(w_dtype).itemsize
    out_bytes = jnp.dtype(out_dtype).itemsize

    # M tile: whole (padded) batch for small B; 128-row tiles otherwise.
    # bf16 LHS needs sublane packing in multiples of 16.
    sub = 16 if lhs_dtype == jnp.bfloat16 else 8
    if B <= 128:
        tm = _round_up(B, sub)
        m_pad = tm
    else:
        tm = 128
        m_pad = _round_up(B, tm)
    m_tiles = m_pad // tm
    n_tiles = n_pad // tn

    # v7x megacore: make sure there are >=2 'parallel' grid steps when possible.
    if m_tiles * n_tiles == 1:
        if n_pad >= 256 and n_pad % 256 == 0:
            tn = n_pad // 2                 # still a multiple of 128
            n_tiles = 2
        elif tm >= 2 * sub and tm % (2 * sub) == 0:
            tm = tm // 2
            m_tiles = m_pad // tm

    # ---- Weight: only pad/cast if the caller did not pre-prepare it ---------
    if w.shape != (k_pad, n_pad) or w.dtype != w_dtype:
        wp = jnp.pad(w, ((0, k_pad - w.shape[0]), (0, n_pad - w.shape[1])))
        wp = wp.astype(w_dtype)
    else:
        wp = w

    # ---- Fused LHS: (x * alpha), cast to MXU operand dtype, padded ----------
    lhs = x * alpha
    if use_bf16_matmul:
        lhs = lhs.astype(jnp.bfloat16)
    lhs = jnp.pad(lhs, ((0, m_pad - B), (0, k_pad - IN)))

    gp = jnp.pad(gamma.astype(jnp.float32),
                 ((0, m_pad - B), (0, n_pad - out_features)))
    bp = jnp.pad(bias.astype(jnp.float32),
                 ((0, m_pad - B), (0, n_pad - out_features)))

    # ---- Whole-K residency vs K-tiled fallback (generation-gated VMEM budget)
    capacity = _vmem_capacity_bytes()
    budget = min(int(capacity * 0.78), 100 * 1024 * 1024)   # ~50 MiB v7x, ~100 MiB v5e/v6e
    headroom = 4 * 1024 * 1024                               # Mosaic internal scratch

    def step_bytes(tk_):
        return (tm * tk_ * lhs_bytes          # fused lhs tile
                + tk_ * tn * w_bytes          # weight tile
                + 2 * tm * tn * 4             # gamma + bias tiles
                + tm * tn * out_bytes)        # output tile

    whole_k = (2 * step_bytes(k_pad) + headroom) <= budget
    if whole_k:
        tk = k_pad
        grid = (m_tiles, n_tiles)
        dims = ("parallel", "parallel")
    else:
        tk = 512 if k_pad % 512 == 0 else (256 if k_pad % 256 == 0 else 128)
        grid = (m_tiles, n_tiles, k_pad // tk)
        dims = ("parallel", "parallel", "arbitrary")

    vmem_needed = 2 * step_bytes(tk) + (0 if whole_k else tm * tn * 4) + headroom
    vmem_limit = int(min(max(vmem_needed, 32 * 1024 * 1024), budget))

    cost = pl.CostEstimate(
        flops=2 * m_pad * k_pad * n_pad,
        transcendentals=0,
        bytes_accessed=(m_pad * k_pad * lhs_bytes
                        + m_tiles * k_pad * n_pad * w_bytes
                        + 2 * m_pad * n_pad * 4
                        + m_pad * n_pad * out_bytes),
    )

    if whole_k:
        out = pl.pallas_call(
            _be_fc_kernel_resident_k,
            out_shape=jax.ShapeDtypeStruct((m_pad, n_pad), out_dtype),
            grid_spec=pltpu.PrefetchScalarGridSpec(
                num_scalar_prefetch=0,
                grid=grid,
                in_specs=[
                    pl.BlockSpec((tm, k_pad), lambda i, j: (i, 0)),  # lhs (1 DMA / M tile)
                    pl.BlockSpec((k_pad, tn), lambda i, j: (0, j)),  # weight
                    pl.BlockSpec((tm, tn), lambda i, j: (i, j)),     # gamma
                    pl.BlockSpec((tm, tn), lambda i, j: (i, j)),     # bias
                ],
                out_specs=pl.BlockSpec((tm, tn), lambda i, j: (i, j)),
            ),
            compiler_params=pltpu.CompilerParams(
                dimension_semantics=dims, vmem_limit_bytes=vmem_limit),
            cost_estimate=cost,
        )(lhs, wp, gp, bp)
    else:
        out = pl.pallas_call(
            _be_fc_kernel_tiled_k,
            out_shape=jax.ShapeDtypeStruct((m_pad, n_pad), out_dtype),
            grid_spec=pltpu.PrefetchScalarGridSpec(
                num_scalar_prefetch=0,
                grid=grid,
                in_specs=[
                    pl.BlockSpec((tm, tk), lambda i, j, k: (i, k)),  # lhs
                    pl.BlockSpec((tk, tn), lambda i, j, k: (k, j)),  # weight
                    pl.BlockSpec((tm, tn), lambda i, j, k: (i, j)),  # gamma
                    pl.BlockSpec((tm, tn), lambda i, j, k: (i, j)),  # bias
                ],
                out_specs=pl.BlockSpec((tm, tn), lambda i, j, k: (i, j)),
                scratch_shapes=[pltpu.VMEM((tm, tn), jnp.float32)],
            ),
            compiler_params=pltpu.CompilerParams(
                dimension_semantics=dims, vmem_limit_bytes=vmem_limit),
            cost_estimate=cost,
        )(lhs, wp, gp, bp)

    return out[:B, :out_features]


# ----------------------------------------------------------------------------
# Host-side per-example parameter construction (matches the torch module).
# ----------------------------------------------------------------------------
def build_mixup_params(alpha_m, gamma_m, bias_m, batch, rng):
    """mixup=True path: per-example convex mix of two random ensemble members
    (host-side numpy RNG, as in the PyTorch forward; vectorized draws)."""
    num_models = alpha_m.shape[0]
    lam = rng.beta(0.2, 0.2, size=(batch, 1)).astype(np.float32)
    i = rng.randint(num_models, size=batch)
    j = rng.randint(num_models, size=batch)
    a = lam * alpha_m[i] + (1.0 - lam) * alpha_m[j]
    g = lam * gamma_m[i] + (1.0 - lam) * gamma_m[j]
    b = lam * bias_m[i] + (1.0 - lam) * bias_m[j]
    return (jnp.asarray(a, dtype=jnp.float32),
            jnp.asarray(g, dtype=jnp.float32),
            jnp.asarray(b, dtype=jnp.float32))


def build_tiled_params(alpha_m, gamma_m, bias_m, batch):
    """mixup=False path: batch grouped by ensemble member, rows repeated."""
    num_models = alpha_m.shape[0]
    n_per = batch // num_models
    extra = batch - n_per * num_models
    a = jnp.repeat(alpha_m, n_per, axis=0) if n_per else alpha_m
    g = jnp.repeat(gamma_m, n_per, axis=0) if n_per else gamma_m
    b = jnp.repeat(bias_m, n_per, axis=0) if n_per else bias_m
    if extra:
        a = jnp.concatenate([a, a[:extra]], axis=0)
        g = jnp.concatenate([g, g[:extra]], axis=0)
        b = jnp.concatenate([b, b[:extra]], axis=0)
    return a, g, b


def reference_forward(x, w, alpha, gamma, bias, *, use_bf16_matmul=False):
    lhs = x * alpha
    wm = w
    if use_bf16_matmul:
        lhs = lhs.astype(jnp.bfloat16)
        wm = w.astype(jnp.bfloat16)
    y = jnp.dot(lhs, wm, preferred_element_type=jnp.float32)
    return y * gamma + bias


if __name__ == "__main__":
    # Small shapes consistent with BatchEnsemble_orderFC(in=32, out=64, num_models=4)
    num_models = 4
    B, IN, OUT = 8, 32, 64

    key = jax.random.PRNGKey(0)
    kx, kw, ka, kg, kb = jax.random.split(key, 5)

    x = jax.random.normal(kx, (B, IN), dtype=jnp.float32)

    bound = 1.0 / math.sqrt(IN)
    # fc weight stored pre-transposed: (IN, OUT) == torch Linear.weight.T
    w = jax.random.uniform(kw, (IN, OUT), minval=-bound, maxval=bound,
                           dtype=jnp.float32)
    # BatchEnsemble params: alpha, gamma ~ N(1, 0.5); bias ~ U(-bound, bound)
    alpha_m = 1.0 + 0.5 * jax.random.normal(ka, (num_models, IN), dtype=jnp.float32)
    gamma_m = 1.0 + 0.5 * jax.random.normal(kg, (num_models, OUT), dtype=jnp.float32)
    bias_m = jax.random.uniform(kb, (num_models, OUT), minval=-bound, maxval=bound,
                                dtype=jnp.float32)

    # mixup=True (module default): host-side RNG, seeded for determinism.
    rng = np.random.RandomState(0)
    alpha, gamma, bias = build_mixup_params(
        np.asarray(alpha_m), np.asarray(gamma_m), np.asarray(bias_m), B, rng)

    # Prepare (pad / cast) the weight ONCE per dtype; reused across forwards.
    w_f32 = prepare_weight(w, use_bf16_matmul=False)
    w_bf16 = prepare_weight(w, use_bf16_matmul=True)

    fwd = jax.jit(batch_ensemble_fc,
                  static_argnames=("out_features", "use_bf16_matmul"))

    # f32 MXU path (tight check).
    out = jax.block_until_ready(
        fwd(x, w_f32, alpha, gamma, bias,
            out_features=OUT, use_bf16_matmul=False))
    ref = reference_forward(x, w, alpha, gamma, bias, use_bf16_matmul=False)
    assert out.shape == (B, OUT)
    assert jnp.allclose(out, ref, atol=1e-4, rtol=1e-4), "f32 mismatch vs reference"

    # bf16-operand MXU path, f32 accumulation + f32 epilogue.
    out_bf16 = jax.block_until_ready(
        fwd(x, w_bf16, alpha, gamma, bias,
            out_features=OUT, use_bf16_matmul=True))
    ref_bf16 = reference_forward(x, w, alpha, gamma, bias, use_bf16_matmul=True)
    assert jnp.allclose(out_bf16, ref_bf16, atol=2e-2, rtol=2e-2), \
        "bf16 mismatch vs reference"

    print("KERNEL_OK")
</pallas_src>

<mosaic_0001>
module attributes {stable_mosaic.version = 11 : i64} {
  func.func @_be_fc_kernel_resident_k(%arg0: i32, %arg1: i32, %arg2: memref<8x128xf32, #tpu.memory_space<vmem>>, %arg3: memref<128x128xf32, #tpu.memory_space<vmem>>, %arg4: memref<8x128xf32, #tpu.memory_space<vmem>>, %arg5: memref<8x128xf32, #tpu.memory_space<vmem>>, %arg6: memref<8x128xf32, #tpu.memory_space<vmem>>) attributes {dimension_semantics = [#tpu.dimension_semantics<parallel>, #tpu.dimension_semantics<parallel>], iteration_bounds = array<i64: 1, 1>, scalar_prefetch = 0 : i64, scratch_operands = 0 : i64, tpu.core_type = #tpu.core_type<tc>, window_params = [{transform_indices = @transform_0, window_bounds = array<i64: 8, 128>}, {transform_indices = @transform_1, window_bounds = array<i64: 128, 128>}, {transform_indices = @transform_2, window_bounds = array<i64: 8, 128>}, {transform_indices = @transform_3, window_bounds = array<i64: 8, 128>}, {transform_indices = @transform_4, window_bounds = array<i64: 8, 128>}]} {
    %c0 = arith.constant 0 : index
    %c0_0 = arith.constant 0 : index
    %0 = vector.load %arg2[%c0, %c0_0] : memref<8x128xf32, #tpu.memory_space<vmem>>, vector<8x128xf32>
    %c0_1 = arith.constant 0 : index
    %c0_2 = arith.constant 0 : index
    %1 = vector.load %arg3[%c0_1, %c0_2] : memref<128x128xf32, #tpu.memory_space<vmem>>, vector<128x128xf32>
    %cst = arith.constant dense<0.000000e+00> : vector<8x128xf32>
    %2 = tpu.matmul %0, %1, %cst {dimension_numbers = #tpu.dot_dimension_numbers<[1], [0], [0], [1], [0, 0, 1, 1], [], []>} : vector<8x128xf32>, vector<128x128xf32>, vector<8x128xf32> -> vector<8x128xf32>
    %c0_3 = arith.constant 0 : index
    %c0_4 = arith.constant 0 : index
    %3 = vector.load %arg4[%c0_3, %c0_4] : memref<8x128xf32, #tpu.memory_space<vmem>>, vector<8x128xf32>
    %4 = arith.mulf %2, %3 : vector<8x128xf32>
    %c0_5 = arith.constant 0 : index
    %c0_6 = arith.constant 0 : index
    %5 = vector.load %arg5[%c0_5, %c0_6] : memref<8x128xf32, #tpu.memory_space<vmem>>, vector<8x128xf32>
    %6 = arith.addf %4, %5 : vector<8x128xf32>
    %c0_7 = arith.constant 0 : index
    %c0_8 = arith.constant 0 : index
    %7 = vector.load %arg6[%c0_7, %c0_8] : memref<8x128xf32, #tpu.memory_space<vmem>>, vector<8x128xf32>
    tpu.vector_store %arg6[%c0_7, %c0_8], %6 {strides = array<i32>} : memref<8x128xf32, #tpu.memory_space<vmem>>, vector<8x128xf32>,
    return
  }
  func.func @transform_0(%arg0: i32, %arg1: i32) -> (i32, i32) {
    %c0_i32 = arith.constant 0 : i32
    %c0_i32_0 = arith.constant 0 : i32
    return %arg0, %c0_i32 : i32, i32
  }
  func.func @transform_1(%arg0: i32, %arg1: i32) -> (i32, i32) {
    %c0_i32 = arith.constant 0 : i32
    %c0_i32_0 = arith.constant 0 : i32
    return %c0_i32, %arg1 : i32, i32
  }
  func.func @transform_2(%arg0: i32, %arg1: i32) -> (i32, i32) {
    %c0_i32 = arith.constant 0 : i32
    return %arg0, %arg1 : i32, i32
  }
  func.func @transform_3(%arg0: i32, %arg1: i32) -> (i32, i32) {
    %c0_i32 = arith.constant 0 : i32
    return %arg0, %arg1 : i32, i32
  }
  func.func @transform_4(%arg0: i32, %arg1: i32) -> (i32, i32) {
    %c0_i32 = arith.constant 0 : i32
    return %arg0, %arg1 : i32, i32
  }
}

</mosaic_0001>

<bundles_post_ra>
// kernel: mul.1
= control target key start
LH: loop header
LB: loop body
LE: loop exit
PB: predicated region body
PF: predicated region fallthrough
CT: control target
= control target key end

     0   :  { %3 = vsyncpa [#allocation1], 0  ;;  %s104_s0 = inlined_call_operand.hbm [shape: f32[8,32], index: 0, kind: input, shape index: {}]   ;;  %s105_s1 = inlined_call_operand.hbm [shape: f32[8,32], index: 1, kind: input, shape index: {}]   ;;  %s106_s2 = inlined_call_operand.vmem [shape: f32[8,32], index: 2, kind: output, shape index: {}]  }
   0x1   :  { %4 = vsyncpa [#allocation3], 0  ;;  %s78_s9 = smov [#allocation0]   ;;  %s79_s11 = smov [#allocation2]  }
   0x2   :  { %s9_s10 = sshll.u32 %s78_s9, 4  ;;  %s17_s12 = sshll.u32 %s79_s11, 4  ;;  %s10_s10 = int_to_ptr.vmem [resolvable:$true] %s9_s10  ;;  %s18_s12 = int_to_ptr.vmem [resolvable:$true] %s17_s12 }
   0x3   :  { %s42_s13 = scalar_lea.vmem %s10_s10, 128  ;;  %p47_p1 = scmp.lt.s32.totalorder %s10_s10, %s10_s10 }
   0x4   :  { %p43_p0 = scmp.ne.s32.totalorder %s10_s10, %s42_s13  ;;  %p48_p2 = scmp.lt.s32.totalorder %s42_s13, %s42_s13 }
   0x6   :  { %p49_p3 = por %p48_p2, %p47_p1 }
   0x8   :  { %p50_p4 = pnand %p49_p3, %p43_p0 }
   0xa   :  { %53 = shalt.err (!%p50_p4)
}
   0xb   :  { %12 = dma.hbm_to_vmem [thread:$0]  %s104_s0, 128, %s10_s10, [#allocation1]  }
   0xc   :  { %s62_s0 = scalar_lea.vmem %s18_s12, 128  ;;  %p67_p6 = scmp.lt.s32.totalorder %s18_s12, %s18_s12 }
   0xd   :  { %p63_p5 = scmp.ne.s32.totalorder %s18_s12, %s62_s0  ;;  %p68_p7 = scmp.lt.s32.totalorder %s62_s0, %s62_s0 }
   0xf   :  { %p69_p8 = por %p68_p7, %p67_p6 }
  0x11   :  { %p70_p9 = pnand %p69_p8, %p63_p5 }
  0x13   :  { %73 = shalt.err (!%p70_p9)
}
  0x14   :  { %20 = dma.hbm_to_vmem [thread:$0]  %s105_s1, 128, %s18_s12, [#allocation3]  }
  0x15   :  { %74 = dma.done.wait [#allocation1], 128  }
  0x16   :  { %75 = vsyncadd [#allocation1], 4294967168 }
  0x17   :  { %76 = dma.done.wait [#allocation3], 128  }
  0x18   :  { %77 = vsyncadd [#allocation3], 4294967168  ;;  %v23_v0 = vld [vmem:[#allocation0] sm:$0xff]  ;;  %v24_v1 = vld [vmem:[#allocation2] sm:$0xff] }
  0x19   :  { %v27_v2 = vmul.f32 %v24_v1, %v23_v0 }
  0x1b   :  { %29 = vst [vmem:[%s106_s2] sm:$0xff] %v27_v2 }
  0x1c   :  { %30 = vsyncpa [#allocation1], 1 }
  0x1d   :  { %31 = vsyncpa [#allocation3], 1 }

// kernel: batch_ensemble_fc.1
= control target key start
LH: loop header
LB: loop body
LE: loop exit
PB: predicated region body
PF: predicated region fallthrough
CT: control target
= control target key end

     0   :  { %9 = vsyncpa [#allocation3], 0  ;;  %s287_s0 = inlined_call_operand.vmem [shape: f32[8,128], index: 0, kind: input, shape index: {}]   ;;  %s288_s1 = inlined_call_operand.hbm [shape: f32[128,128], index: 1, kind: input, shape index: {}]   ;;  %s289_s2 = inlined_call_operand.vmem [shape: f32[8,128], index: 2, kind: input, shape index: {}]   ;;  %s290_s3 = inlined_call_operand.vmem [shape: f32[8,128], index: 3, kind: input, shape index: {}]   ;;  %s291_s4 = inlined_call_operand.hbm [shape: f32[8,128], index: 4, kind: output, shape index: {}]  }
   0x1   :  { %10 = vsyncpa [#allocation4], 0  ;;  %s241_s15 = smov [#allocation2]  }
   0x2   :  { %s18_s16 = sshll.u32 %s241_s15, 4  ;;  %s19_s16 = int_to_ptr.vmem [resolvable:$true] %s18_s16 }
   0x3   :  { %s205_s17 = scalar_lea.vmem %s19_s16, 2048  ;;  %p210_p1 = scmp.lt.s32.totalorder %s19_s16, %s19_s16 }
   0x4   :  { %p206_p0 = scmp.ne.s32.totalorder %s19_s16, %s205_s17  ;;  %p211_p2 = scmp.lt.s32.totalorder %s205_s17, %s205_s17 }
   0x6   :  { %p212_p3 = por %p211_p2, %p210_p1 }
   0x8   :  { %p213_p4 = pnand %p212_p3, %p206_p0 }
   0xa   :  { %216 = shalt.err (!%p213_p4)
}
   0xb   :  { %s242_s18 = smov 128   ;;  %s243_s19 = smov 8  }
   0xc   :  { %24 = dma.hbm_to_vmem [thread:$0]  %s288_s1, 2048, %s19_s16, [#allocation3], %s242_s18, %s242_s18, %s243_s19  }
   0xd   :  { %237 = dma.done.wait [#allocation3], 2048  }
   0xe   :  { %238 = vsyncadd [#allocation3], 4294965248  ;;  %v244_v0 = vmov 0.0   ;;  %vm245_vm0 = vmmov 0   ;;  %v48_v1 = vld [vmem:[#allocation2 + $0x78] sm:$0xff]  ;;  %v47_v2 = vld [vmem:[#allocation2 + $0x70] sm:$0xff] }
   0xf   :  { %156 = vmatprep.subr.mxu0 %v244_v0  ;;  %188 = vmatprep.mubr.msk.f32.mxu0 %vm245_vm0, %v244_v0  ;;  %v46_v3 = vld [vmem:[#allocation2 + $0x68] sm:$0xff]  ;;  %v45_v4 = vld [vmem:[#allocation2 + $0x60] sm:$0xff]  ;;  %v44_v5 = vld [vmem:[#allocation2 + $0x58] sm:$0xff]  ;;  %s246_s27 = smov [#allocation5]  }
  0x10   :  { %157 = vmatpush3.msra.mxu0 %v48_v1  ;;  %v43_v6 = vld [vmem:[#allocation2 + $0x50] sm:$0xff]  ;;  %v42_v7 = vld [vmem:[#allocation2 + $0x48] sm:$0xff]  ;;  %v41_v8 = vld [vmem:[#allocation2 + $0x40] sm:$0xff]  ;;  %s130_s28 = sshll.u32 %s246_s27, 4  ;;  %s131_s28 = int_to_ptr.vmem [resolvable:$true] %s130_s28 }
  0x11   :  { %158 = vmatprep.subr.mxu0 %v244_v0  ;;  %v40_v9 = vld [vmem:[#allocation2 + $0x38] sm:$0xff]  ;;  %v39_v10 = vld [vmem:[#allocation2 + $0x30] sm:$0xff]  ;;  %v38_v11 = vld [vmem:[#allocation2 + $0x28] sm:$0xff]  ;;  %p222_p6 = scmp.lt.s32.totalorder %s131_s28, %s131_s28 }
  0x12   :  { %159 = vmatpush3.msra.mxu0 %v47_v2  ;;  %v37_v12 = vld [vmem:[#allocation2 + $0x20] sm:$0xff]  ;;  %v36_v13 = vld [vmem:[#allocation2 + $0x18] sm:$0xff]  ;;  %v35_v14 = vld [vmem:[#allocation2 + $0x10] sm:$0xff] }
  0x13   :  { %160 = vmatprep.subr.mxu0 %v244_v0  ;;  %v34_v15 = vld [vmem:[#allocation2 + $0x8] sm:$0xff]  ;;  %v33_v16 = vld [vmem:[#allocation2] sm:$0xff] }
  0x14   :  { %161 = vmatpush3.msra.mxu0 %v46_v3  ;;  %v32_v17 = vld [vmem:[%s287_s0] sm:$0xff]  ;;  %s217_s0 = scalar_lea.vmem %s131_s28, 128 }
  0x15   :  { %162 = vmatprep.subr.mxu0 %v244_v0  ;;  %v119_v18 = vld [vmem:[%s289_s2] sm:$0xff]  ;;  %p218_p5 = scmp.ne.s32.totalorder %s131_s28, %s217_s0  ;;  %p223_p7 = scmp.lt.s32.totalorder %s217_s0, %s217_s0 }
  0x16   :  { %163 = vmatpush3.msra.mxu0 %v45_v4  ;;  %v121_v20 = vld [vmem:[%s290_s3] sm:$0xff] }
  0x17   :  { %164 = vmatprep.subr.mxu0 %v244_v0  ;;  %p224_p8 = por %p223_p7, %p222_p6 }
  0x18   :  { %165 = vmatpush3.msra.mxu0 %v44_v5 }
  0x19   :  { %166 = vmatprep.subr.mxu0 %v244_v0  ;;  %p225_p9 = pnand %p224_p8, %p218_p5 }
  0x1a   :  { %167 = vmatpush3.msra.mxu0 %v43_v6 }
  0x1b   :  { %168 = vmatprep.subr.mxu0 %v244_v0 }
  0x1c   :  { %169 = vmatpush3.msra.mxu0 %v42_v7 }
  0x1d   :  { %170 = vmatprep.subr.mxu0 %v244_v0 }
  0x1e   :  { %171 = vmatpush3.msra.mxu0 %v41_v8 }
  0x1f   :  { %172 = vmatprep.subr.mxu0 %v244_v0 }
  0x20   :  { %173 = vmatpush3.msra.mxu0 %v40_v9 }
  0x21   :  { %174 = vmatprep.subr.mxu0 %v244_v0 }
  0x22   :  { %175 = vmatpush3.msra.mxu0 %v39_v10 }
  0x23   :  { %176 = vmatprep.subr.mxu0 %v244_v0 }
  0x24   :  { %177 = vmatpush3.msra.mxu0 %v38_v11 }
  0x25   :  { %178 = vmatprep.subr.mxu0 %v244_v0 }
  0x26   :  { %179 = vmatpush3.msra.mxu0 %v37_v12 }
  0x27   :  { %180 = vmatprep.subr.mxu0 %v244_v0 }
  0x28   :  { %181 = vmatpush3.msra.mxu0 %v36_v13 }
  0x29   :  { %182 = vmatprep.subr.mxu0 %v244_v0 }
  0x2a   :  { %183 = vmatpush3.msra.mxu0 %v35_v14 }
  0x2b   :  { %184 = vmatprep.subr.mxu0 %v244_v0 }
  0x2c   :  { %185 = vmatpush3.msra.mxu0 %v34_v15 }
  0x2d   :  { %186 = vmatprep.subr.mxu0 %v244_v0 }
  0x2e   :  { %187 = vmatpush3.msra.mxu0 %v33_v16 }
  0x2f   :  { %189 = vmatmul.mubr.f32.vlgmr.msra.gmra.mxu0 %v32_v17 }
  0xef   :  { %v115_v19 = vpop.f32.mrf.mxu0 }
  0xf0   :  { %v120_v21 = vmul.f32 %v119_v18, %v115_v19 }
  0xf1   :  { %v190_v22 = vpop.f32.mrf.mxu0 }
  0xf2   :  { %v122_v23 = vadd.f32 %v121_v20, %v120_v21 }
  0xf4   :  { %123 = vst [vmem:[#allocation5] sm:$0xff] %v122_v23 }
  0xf5   :  { %228 = shalt.err (!%p225_p9)
}
  0xf6   :  { %133 = dma.vmem_to_hbm [thread:$0]  %s131_s28, 128, %s291_s4, [#allocation4]  }
  0xf7   :  { %239 = dma.done.wait [#allocation4], 128  }
  0xf8   :  { %240 = vsyncadd [#allocation4], 4294967168 }
  0xf9   :  { %137 = vsyncpa [#allocation3], 1 }
  0xfa   :  { %138 = vsyncpa [#allocation4], 1 }

</bundles_post_ra>
